<compile_context>
chip_gen: v6e
topology: v6e:2x2x1
jax: 0.10.0
libtpu: 0.0.40
codegen_flags: <defaults>
</compile_context>

<pallas_src>
import jax
import jax.numpy as jnp
from jax.experimental import pallas as pl
from jax.experimental.pallas import tpu as pltpu


def _round_up(x, m):
    return ((x + m - 1) // m) * m


def _leaky_relu(x, slope=0.2):
    # max(x, a*x) == LeakyReLU(a) for 0 < a < 1 (mul+max = 2 VALU ops).
    return jnp.maximum(x, slope * x)


def generator_kernel(xT_ref, w1_ref, b1_ref, w2_ref, b2_ref, w3_ref, b3_ref,
                     w4c_ref, b4c_ref, out_ref):
    """Feature-major MLP tile: every tensor is (features, TB); batch on lanes."""
    cdt = w1_ref.dtype                 # dtype for layers 1-3 (f32 default)
    h = xT_ref[...].astype(cdt)        # cast under the pipeline (no wrapper pass)

    # Three Linear + LeakyReLU(0.2) layers: h <- leaky(W @ h + b).
    for w_ref, b_ref in ((w1_ref, b1_ref), (w2_ref, b2_ref), (w3_ref, b3_ref)):
        acc = jnp.dot(w_ref[...], h, preferred_element_type=jnp.float32)
        h = _leaky_relu(acc.astype(cdt) + b_ref[...])

    # Fused [Linear(8, ndim) | fc] in f32: rows [0:ndim] = latent, row ndim = out.
    y = jnp.dot(w4c_ref[...], h.astype(jnp.float32),
                preferred_element_type=jnp.float32) + b4c_ref[...]
    out_ref[...] = y                   # (n_out, TB), lane-dense unmasked store


def generator_forward(x, params, *, tb_cap=2048, elementwise_dtype=jnp.float32):
    """x: (B, xdim) f32.  params: PyTorch-layout weights w*: (out,in), b*: (out,).

    Returns (latent (B, ndim) f32, out (B, 1) f32).
    """
    B, xdim = x.shape
    ndim = params["w4"].shape[0]
    f32 = jnp.float32

    # ---- Fold fc into the latent layer, in f32 (exact consistency). ----
    w4 = params["w4"].astype(f32)                       # (ndim, 8)
    b4 = params["b4"].astype(f32).reshape(ndim, 1)      # (ndim, 1)
    wf = params["wf"].astype(f32)                       # (1, ndim)
    bf = params["bf"].astype(f32).reshape(1, 1)         # (1, 1)
    w4c = jnp.concatenate([w4, wf @ w4], axis=0)        # (ndim+1, 8)
    b4c = jnp.concatenate([b4, wf @ b4 + bf], axis=0)   # (ndim+1, 1)

    # Pad combined feature dim to a multiple of 8 sublanes -> unmasked stores.
    n_out = _round_up(ndim + 1, 8)
    if n_out != ndim + 1:
        w4c = jnp.pad(w4c, ((0, n_out - (ndim + 1)), (0, 0)))
        b4c = jnp.pad(b4c, ((0, n_out - (ndim + 1)), (0, 0)))

    # ---- Lane-dense tiling: batch on the lane axis, TB multiple of 128. ----
    TB = _round_up(min(tb_cap, _round_up(B, 128)), 128)
    Bp = _round_up(B, TB)
    xT = x.astype(f32).T                                # (xdim, B) layout plumbing
    if Bp != B:
        xT = jnp.pad(xT, ((0, 0), (0, Bp - B)))
    n_tiles = Bp // TB

    cdt = elementwise_dtype
    w1 = params["w1"].astype(cdt); b1 = params["b1"].astype(cdt).reshape(-1, 1)
    w2 = params["w2"].astype(cdt); b2 = params["b2"].astype(cdt).reshape(-1, 1)
    w3 = params["w3"].astype(cdt); b3 = params["b3"].astype(cdt).reshape(-1, 1)

    operands = (xT, w1, b1, w2, b2, w3, b3, w4c, b4c)

    def const_spec(arr):
        # Weights/biases: same block every grid step -> stay VMEM-resident.
        return pl.BlockSpec(arr.shape, lambda i: (0,) * arr.ndim)

    in_specs = [pl.BlockSpec((xdim, TB), lambda i: (0, i))] + [
        const_spec(a) for a in operands[1:]
    ]
    out_specs = pl.BlockSpec((n_out, TB), lambda i: (0, i))

    # Advisory cost estimate for XLA scheduling.
    flops = 2 * Bp * (xdim * 32 + 32 * 16 + 16 * 8 + 8 * n_out)
    w_bytes = sum(int(a.size) * a.dtype.itemsize for a in operands[1:])
    bytes_accessed = Bp * xdim * 4 + w_bytes + Bp * n_out * 4

    combined = pl.pallas_call(
        generator_kernel,
        out_shape=jax.ShapeDtypeStruct((n_out, Bp), jnp.float32),
        grid=(n_tiles,),
        in_specs=in_specs,
        out_specs=out_specs,
        compiler_params=pltpu.CompilerParams(
            dimension_semantics=("parallel",),
            vmem_limit_bytes=16 * 1024 * 1024,   # per-tile footprint << 4 MiB
        ),
        cost_estimate=pl.CostEstimate(
            flops=flops, transcendentals=0, bytes_accessed=bytes_accessed),
    )(*operands)

    latent = combined[:ndim, :B].T                      # (B, ndim)
    out = combined[ndim:ndim + 1, :B].T                 # (B, 1)
    return latent, out


def init_params(key, xdim, ndim):
    """Deterministic init mimicking nn.Linear (PyTorch layout: w (out,in), b (out,))."""
    dims = [(xdim, 32), (32, 16), (16, 8), (8, ndim), (ndim, 1)]
    names = ["1", "2", "3", "4", "f"]
    params = {}
    for (din, dout), name in zip(dims, names):
        key, kw, kb = jax.random.split(key, 3)
        bound = float(din) ** -0.5
        params[f"w{name}"] = jax.random.uniform(
            kw, (dout, din), jnp.float32, minval=-bound, maxval=bound)
        params[f"b{name}"] = jax.random.uniform(
            kb, (dout,), jnp.float32, minval=-bound, maxval=bound)
    return params


def reference_forward(x, params):
    """Pure-JAX f32 reference (highest matmul precision) for sanity checking."""
    hp = jax.lax.Precision.HIGHEST
    h = x
    for name in ["1", "2", "3"]:
        h = jnp.dot(h, params[f"w{name}"].T, precision=hp) + params[f"b{name}"]
        h = jnp.where(h > 0, h, 0.2 * h)
    latent = jnp.dot(h, params["w4"].T, precision=hp) + params["b4"]
    out = jnp.dot(latent, params["wf"].T, precision=hp) + params["bf"]
    return latent, out


if __name__ == "__main__":
    B, xdim, ndim = 8, 16, 4

    key = jax.random.PRNGKey(0)
    kx, kp = jax.random.split(key)
    x = jax.random.normal(kx, (B, xdim), jnp.float32)
    params = init_params(kp, xdim, ndim)

    latent, out = generator_forward(x, params)
    latent, out = jax.block_until_ready((latent, out))

    lat_ref, out_ref = reference_forward(x, params)
    assert latent.shape == (B, ndim) and out.shape == (B, 1)
    # Kernel runs in f32 end-to-end by default -> tight tolerance.
    assert jnp.allclose(latent, lat_ref, atol=1e-3, rtol=1e-3)
    assert jnp.allclose(out, out_ref, atol=1e-3, rtol=1e-3)

    print("KERNEL_OK")
</pallas_src>

<mosaic_0001>
module attributes {stable_mosaic.version = 11 : i64} {
  func.func @generator_kernel(%arg0: i32, %arg1: memref<16x128xf32, #tpu.memory_space<vmem>>, %arg2: memref<32x16xf32, #tpu.memory_space<vmem>>, %arg3: memref<32x1xf32, #tpu.memory_space<vmem>>, %arg4: memref<16x32xf32, #tpu.memory_space<vmem>>, %arg5: memref<16x1xf32, #tpu.memory_space<vmem>>, %arg6: memref<8x16xf32, #tpu.memory_space<vmem>>, %arg7: memref<8x1xf32, #tpu.memory_space<vmem>>, %arg8: memref<8x8xf32, #tpu.memory_space<vmem>>, %arg9: memref<8x1xf32, #tpu.memory_space<vmem>>, %arg10: memref<8x128xf32, #tpu.memory_space<vmem>>) attributes {dimension_semantics = [#tpu.dimension_semantics<parallel>], iteration_bounds = array<i64: 1>, scalar_prefetch = 0 : i64, scratch_operands = 0 : i64, tpu.core_type = #tpu.core_type<tc>, window_params = [{transform_indices = @transform_0, window_bounds = array<i64: 16, 128>}, {pipeline_mode = #tpu.pipeline_mode<synchronous>, transform_indices = @transform_1, window_bounds = array<i64: 32, 16>}, {pipeline_mode = #tpu.pipeline_mode<synchronous>, transform_indices = @transform_2, window_bounds = array<i64: 32, 1>}, {pipeline_mode = #tpu.pipeline_mode<synchronous>, transform_indices = @transform_3, window_bounds = array<i64: 16, 32>}, {pipeline_mode = #tpu.pipeline_mode<synchronous>, transform_indices = @transform_4, window_bounds = array<i64: 16, 1>}, {pipeline_mode = #tpu.pipeline_mode<synchronous>, transform_indices = @transform_5, window_bounds = array<i64: 8, 16>}, {pipeline_mode = #tpu.pipeline_mode<synchronous>, transform_indices = @transform_6, window_bounds = array<i64: 8, 1>}, {pipeline_mode = #tpu.pipeline_mode<synchronous>, transform_indices = @transform_7, window_bounds = array<i64: 8, 8>}, {pipeline_mode = #tpu.pipeline_mode<synchronous>, transform_indices = @transform_8, window_bounds = array<i64: 8, 1>}, {transform_indices = @transform_9, window_bounds = array<i64: 8, 128>}]} {
    %c0 = arith.constant 0 : index
    %c0_0 = arith.constant 0 : index
    %0 = vector.load %arg1[%c0, %c0_0] : memref<16x128xf32, #tpu.memory_space<vmem>>, vector<16x128xf32>
    %c0_1 = arith.constant 0 : index
    %c0_2 = arith.constant 0 : index
    %1 = vector.load %arg2[%c0_1, %c0_2] : memref<32x16xf32, #tpu.memory_space<vmem>>, vector<32x16xf32>
    %cst = arith.constant dense<0.000000e+00> : vector<32x128xf32>
    %2 = tpu.matmul %1, %0, %cst {dimension_numbers = #tpu.dot_dimension_numbers<[1], [0], [0], [1], [0, 0, 1, 1], [], []>} : vector<32x16xf32>, vector<16x128xf32>, vector<32x128xf32> -> vector<32x128xf32>
    %c0_3 = arith.constant 0 : index
    %c0_4 = arith.constant 0 : index
    %3 = vector.load %arg3[%c0_3, %c0_4] : memref<32x1xf32, #tpu.memory_space<vmem>>, vector<32x1xf32>
    %4 = vector.broadcast %3 : vector<32x1xf32> to vector<32x128xf32>
    %5 = arith.addf %2, %4 : vector<32x128xf32>
    %cst_5 = arith.constant 2.000000e-01 : f32
    %6 = vector.broadcast %cst_5 : f32 to vector<32x128xf32>
    %7 = arith.mulf %6, %5 : vector<32x128xf32>
    %8 = arith.maximumf %5, %7 : vector<32x128xf32>
    %c0_6 = arith.constant 0 : index
    %c0_7 = arith.constant 0 : index
    %9 = vector.load %arg4[%c0_6, %c0_7] : memref<16x32xf32, #tpu.memory_space<vmem>>, vector<16x32xf32>
    %cst_8 = arith.constant dense<0.000000e+00> : vector<16x128xf32>
    %10 = tpu.matmul %9, %8, %cst_8 {dimension_numbers = #tpu.dot_dimension_numbers<[1], [0], [0], [1], [0, 0, 1, 1], [], []>} : vector<16x32xf32>, vector<32x128xf32>, vector<16x128xf32> -> vector<16x128xf32>
    %c0_9 = arith.constant 0 : index
    %c0_10 = arith.constant 0 : index
    %11 = vector.load %arg5[%c0_9, %c0_10] : memref<16x1xf32, #tpu.memory_space<vmem>>, vector<16x1xf32>
    %12 = vector.broadcast %11 : vector<16x1xf32> to vector<16x128xf32>
    %13 = arith.addf %10, %12 : vector<16x128xf32>
    %cst_11 = arith.constant 2.000000e-01 : f32
    %14 = vector.broadcast %cst_11 : f32 to vector<16x128xf32>
    %15 = arith.mulf %14, %13 : vector<16x128xf32>
    %16 = arith.maximumf %13, %15 : vector<16x128xf32>
    %c0_12 = arith.constant 0 : index
    %c0_13 = arith.constant 0 : index
    %17 = vector.load %arg6[%c0_12, %c0_13] : memref<8x16xf32, #tpu.memory_space<vmem>>, vector<8x16xf32>
    %cst_14 = arith.constant dense<0.000000e+00> : vector<8x128xf32>
    %18 = tpu.matmul %17, %16, %cst_14 {dimension_numbers = #tpu.dot_dimension_numbers<[1], [0], [0], [1], [0, 0, 1, 1], [], []>} : vector<8x16xf32>, vector<16x128xf32>, vector<8x128xf32> -> vector<8x128xf32>
    %c0_15 = arith.constant 0 : index
    %c0_16 = arith.constant 0 : index
    %19 = vector.load %arg7[%c0_15, %c0_16] : memref<8x1xf32, #tpu.memory_space<vmem>>, vector<8x1xf32>
    %20 = vector.broadcast %19 : vector<8x1xf32> to vector<8x128xf32>
    %21 = arith.addf %18, %20 : vector<8x128xf32>
    %cst_17 = arith.constant 2.000000e-01 : f32
    %22 = vector.broadcast %cst_17 : f32 to vector<8x128xf32>
    %23 = arith.mulf %22, %21 : vector<8x128xf32>
    %24 = arith.maximumf %21, %23 : vector<8x128xf32>
    %c0_18 = arith.constant 0 : index
    %c0_19 = arith.constant 0 : index
    %25 = vector.load %arg8[%c0_18, %c0_19] : memref<8x8xf32, #tpu.memory_space<vmem>>, vector<8x8xf32>
    %cst_20 = arith.constant dense<0.000000e+00> : vector<8x128xf32>
    %26 = tpu.matmul %25, %24, %cst_20 {dimension_numbers = #tpu.dot_dimension_numbers<[1], [0], [0], [1], [0, 0, 1, 1], [], []>} : vector<8x8xf32>, vector<8x128xf32>, vector<8x128xf32> -> vector<8x128xf32>
    %c0_21 = arith.constant 0 : index
    %c0_22 = arith.constant 0 : index
    %27 = vector.load %arg9[%c0_21, %c0_22] : memref<8x1xf32, #tpu.memory_space<vmem>>, vector<8x1xf32>
    %28 = vector.broadcast %27 : vector<8x1xf32> to vector<8x128xf32>
    %29 = arith.addf %26, %28 : vector<8x128xf32>
    %c0_23 = arith.constant 0 : index
    %c0_24 = arith.constant 0 : index
    %30 = vector.load %arg10[%c0_23, %c0_24] : memref<8x128xf32, #tpu.memory_space<vmem>>, vector<8x128xf32>
    tpu.vector_store %arg10[%c0_23, %c0_24], %29 {strides = array<i32>} : memref<8x128xf32, #tpu.memory_space<vmem>>, vector<8x128xf32>,
    return
  }
  func.func @transform_0(%arg0: i32) -> (i32, i32) {
    %c0_i32 = arith.constant 0 : i32
    %c0_i32_0 = arith.constant 0 : i32
    return %c0_i32, %arg0 : i32, i32
  }
  func.func @transform_1(%arg0: i32) -> (i32, i32) {
    %c0_i32 = arith.constant 0 : i32
    %c0_i32_0 = arith.constant 0 : i32
    %c0_i32_1 = arith.constant 0 : i32
    return %c0_i32, %c0_i32_0 : i32, i32
  }
  func.func @transform_2(%arg0: i32) -> (i32, i32) {
    %c0_i32 = arith.constant 0 : i32
    %c0_i32_0 = arith.constant 0 : i32
    %c0_i32_1 = arith.constant 0 : i32
    return %c0_i32, %c0_i32_0 : i32, i32
  }
  func.func @transform_3(%arg0: i32) -> (i32, i32) {
    %c0_i32 = arith.constant 0 : i32
    %c0_i32_0 = arith.constant 0 : i32
    %c0_i32_1 = arith.constant 0 : i32
    return %c0_i32, %c0_i32_0 : i32, i32
  }
  func.func @transform_4(%arg0: i32) -> (i32, i32) {
    %c0_i32 = arith.constant 0 : i32
    %c0_i32_0 = arith.constant 0 : i32
    %c0_i32_1 = arith.constant 0 : i32
    return %c0_i32, %c0_i32_0 : i32, i32
  }
  func.func @transform_5(%arg0: i32) -> (i32, i32) {
    %c0_i32 = arith.constant 0 : i32
    %c0_i32_0 = arith.constant 0 : i32
    %c0_i32_1 = arith.constant 0 : i32
    return %c0_i32, %c0_i32_0 : i32, i32
  }
  func.func @transform_6(%arg0: i32) -> (i32, i32) {
    %c0_i32 = arith.constant 0 : i32
    %c0_i32_0 = arith.constant 0 : i32
    %c0_i32_1 = arith.constant 0 : i32
    return %c0_i32, %c0_i32_0 : i32, i32
  }
  func.func @transform_7(%arg0: i32) -> (i32, i32) {
    %c0_i32 = arith.constant 0 : i32
    %c0_i32_0 = arith.constant 0 : i32
    %c0_i32_1 = arith.constant 0 : i32
    return %c0_i32, %c0_i32_0 : i32, i32
  }
  func.func @transform_8(%arg0: i32) -> (i32, i32) {
    %c0_i32 = arith.constant 0 : i32
    %c0_i32_0 = arith.constant 0 : i32
    %c0_i32_1 = arith.constant 0 : i32
    return %c0_i32, %c0_i32_0 : i32, i32
  }
  func.func @transform_9(%arg0: i32) -> (i32, i32) {
    %c0_i32 = arith.constant 0 : i32
    %c0_i32_0 = arith.constant 0 : i32
    return %c0_i32, %arg0 : i32, i32
  }
}

</mosaic_0001>

<bundles_post_ra>
// kernel: tpu_custom_call.1
= control target key start
LH: loop header
LB: loop body
LE: loop exit
PB: predicated region body
PF: predicated region fallthrough
CT: control target
= control target key end

     0   :  { %vm63_vm0 = vcmask 130048   ;;  %v533_v4 = vmov 0   ;;  %s651_s0 = inlined_call_operand.vmem [shape: f32[16,128], index: 0, kind: input, shape index: {}]   ;;  %s652_s1 = inlined_call_operand.vmem [shape: f32[32,16], index: 1, kind: input, shape index: {}]   ;;  %s653_s2 = inlined_call_operand.vmem [shape: f32[32,1], index: 2, kind: input, shape index: {}]   ;;  %s654_s3 = inlined_call_operand.vmem [shape: f32[16,32], index: 3, kind: input, shape index: {}]   ;;  %s655_s4 = inlined_call_operand.vmem [shape: f32[16,1], index: 4, kind: input, shape index: {}]   ;;  %s656_s5 = inlined_call_operand.vmem [shape: f32[8,16], index: 5, kind: input, shape index: {}]   ;;  %s657_s6 = inlined_call_operand.vmem [shape: f32[8,1], index: 6, kind: input, shape index: {}]   ;;  %s658_s7 = inlined_call_operand.vmem [shape: f32[8,8], index: 7, kind: input, shape index: {}]   ;;  %s659_s8 = inlined_call_operand.vmem [shape: f32[8,1], index: 8, kind: input, shape index: {}]   ;;  %s660_s9 = inlined_call_operand.hbm [shape: f32[8,128], index: 9, kind: output, shape index: {}]  }
   0x1   :  { %v34_v0 = vld [vmem:[%s651_s0 + $0x8] sm:$0xff]  ;;  %v33_v1 = vld [vmem:[%s651_s0] sm:$0xff]  ;;  %509 = vset.pattern.permute.xlu0 %v533_v4  ;;  %v42_v5 = vld [vmem:[%s653_s2 + $0x18] sm:$0xff]  ;;  %510 = vset.pattern.permute.xlu1 %v533_v4 }
   0x2   :  { %v35_v2 = vld [vmem:[%s652_s1] sm:$0xff]  ;;  %472 = vmatprep.subr.mxu0 %v34_v0  ;;  %v36_v3 = vld [vmem:[%s652_s1 + $0x8] sm:$0xff]  ;;  %v37_v7 = vld [vmem:[%s652_s1 + $0x10] sm:$0xff]  ;;  %60 = vperm.xlu0 %509, %v42_v5  }
   0x3   :  { %476 = vmatprep.mubr.msk.f32.mxu0 %vm63_vm0, %v35_v2  ;;  %473 = vmatpush3.msra.mxu0 %v34_v0  ;;  %v40_v6 = vld [vmem:[%s653_s2 + $0x8] sm:$0xff]  ;;  %v41_v8 = vld [vmem:[%s653_s2 + $0x10] sm:$0xff] }
   0x4   :  { %474 = vmatprep.subr.mxu0 %v33_v1 }
   0x5   :  { %475 = vmatpush3.msra.mxu0 %v33_v1 }
   0x6   :  { %14 = vsyncpa [#allocation3], 0  ;;  %477 = vmatmul.mubr.msk.f32.vlgmr.msra.gmra.mxu0 %vm63_vm0, %v36_v3  ;;  %50 = vperm.xlu1 %510, %v40_v6   ;;  %v38_v9 = vld [vmem:[%s652_s1 + $0x18] sm:$0xff]  ;;  %v39_v10 = vld [vmem:[%s653_s2] sm:$0xff]  ;;  %vm183_vm1 = vcmask 261120   ;;  %v534_v37 = vmov 0.0  }
   0x7   :  { %479 = vmatprep.mubr.msk.f32.mxu0 %vm63_vm0, %v37_v7  ;;  %55 = vperm.xlu0 %509, %v41_v8   ;;  %v172_v11 = vld [vmem:[%s655_s4 + $0x8] sm:$0xff]  ;;  %v171_v12 = vld [vmem:[%s655_s4] sm:$0xff]  ;;  %vm535_vm2 = vmmov 0   ;;  %vm358_vm3 = vcmask 64512   ;;  %s536_s17 = smov [#allocation2]  }
   0x8   :  { %v270_v13 = vld [vmem:[%s657_s6] sm:$0xff]  ;;  %v170_v36 = vld [vmem:[%s654_s3 + $0x8] sm:$0xff]  ;;  %493 = vmatprep.subr.mxu0 %v534_v37  ;;  %s439_s18 = sshll.u32 %s536_s17, 4  ;;  %s440_s18 = int_to_ptr.vmem [resolvable:$true] %s439_s18 }
   0x9   :  { %v352_v14 = vld [vmem:[%s659_s8] sm:$0xff]  ;;  %p516_p1 = scmp.lt.s32.totalorder %s440_s18, %s440_s18 }
   0xa   :  { %480 = vmatmul.mubr.msk.f32.gmra.mxu0 %vm63_vm0, %v38_v9  ;;  %45 = vperm.xlu1 %510, %v39_v10   ;;  %v169_v15 = vld [vmem:[%s654_s3] sm:$0xff] }
   0xb   :  { %180 = vperm.xlu0 %509, %v172_v11   ;;  %490 = vmatprep.mubr.msk.f32.mxu1 %vm183_vm1, %v169_v15  ;;  %v269_v48 = vld [vmem:[%s656_s5] sm:$0xff]  ;;  %s511_s5 = scalar_lea.vmem %s440_s18, 128 }
   0xc   :  { %497 = vmatprep.mubr.msk.f32.mxu0 %vm535_vm2, %v534_v37  ;;  %v351_v55 = vld [vmem:[%s658_s7] sm:$0xff]  ;;  %p512_p0 = scmp.ne.s32.totalorder %s440_s18, %s511_s5  ;;  %p517_p2 = scmp.lt.s32.totalorder %s511_s5, %s511_s5 }
   0xe   :  { %175 = vperm.xlu1 %510, %v171_v12   ;;  %p518_p3 = por %p517_p2, %p516_p1 }
   0xf   :  { %273 = vperm.xlu0 %509, %v270_v13  }
  0x10   :  { %p519_p4 = pnand %p518_p3, %p512_p0 }
  0x12   :  { %355 = vperm.xlu1 %510, %v352_v14  }
  0x7d   :  { %v61_v16 = vpop.permute.xlu0 %60 }
  0x81   :  { %v51_v17 = vpop.permute.xlu1 %50 }
  0x82   :  { %v56_v21 = vpop.permute.xlu0 %55 }
  0x85   :  { %v46_v24 = vpop.permute.xlu1 %45 }
  0x86   :  { %v181_v38 = vpop.permute.xlu0 %180 }
  0x89   :  { %v176_v41 = vpop.permute.xlu1 %175 }
  0x8a   :  { %v274_v49 = vpop.permute.xlu0 %273 }
  0x8d   :  { %v356_v56 = vpop.permute.xlu1 %355 }
  0xc6   :  { %v478_v18 = vpop.f32.mrf.mxu0 }
  0xc7   :  { %v148_v22 = vadd.f32 %v478_v18, %v51_v17 }
  0xc8   :  { %v142_v19 = vpop.f32.mrf.mxu0 }
  0xc9   :  { %v143_v26 = vadd.f32 %v142_v19, %v46_v24  ;;  %v162_v29 = vmul.f32 0.2, %v148_v22 }
  0xca   :  { %v481_v20 = vpop.f32.mrf.mxu0 }
  0xcb   :  { %v158_v23 = vadd.f32 %v481_v20, %v61_v16  ;;  %v161_v32 = vmul.f32 0.2, %v143_v26  ;;  %v166_v34 = vmax.f32 %v148_v22, %v162_v29 }
  0xcc   :  { %v152_v25 = vpop.f32.mrf.mxu0 }
  0xcd   :  { %v164_v27 = vmul.f32 0.2, %v158_v23  ;;  %v153_v28 = vadd.f32 %v152_v25, %v56_v21  ;;  %v165_v35 = vmax.f32 %v143_v26, %v161_v32 }
  0xcf   :  { %v163_v30 = vmul.f32 0.2, %v153_v28  ;;  %v168_v31 = vmax.f32 %v158_v23, %v164_v27 }
  0xd1   :  { %v167_v33 = vmax.f32 %v153_v28, %v163_v30  ;;  %482 = vmatprep.subr.mxu1 %v168_v31 }
  0xd2   :  { %483 = vmatpush3.msra.mxu1 %v168_v31 }
  0xd3   :  { %484 = vmatprep.subr.mxu1 %v167_v33 }
  0xd4   :  { %485 = vmatpush3.msra.mxu1 %v167_v33 }
  0xd5   :  { %486 = vmatprep.subr.mxu1 %v166_v34 }
  0xd6   :  { %487 = vmatpush3.msra.mxu1 %v166_v34 }
  0xd7   :  { %488 = vmatprep.subr.mxu1 %v165_v35 }
  0xd8   :  { %489 = vmatpush3.msra.mxu1 %v165_v35 }
  0xd9   :  { %491 = vmatmul.mubr.msk.f32.vlgmr.msra.gmra.mxu1 %vm183_vm1, %v170_v36  ;;  %500 = vmatprep.subr.mxu1 %v534_v37 }
  0xda   :  { %502 = vmatprep.mubr.msk.f32.mxu1 %vm535_vm2, %v534_v37 }
 0x199   :  { %v492_v39 = vpop.f32.mrf.mxu1 }
 0x19a   :  { %v262_v40 = vadd.f32 %v492_v39, %v181_v38 }
 0x19b   :  { %v256_v42 = vpop.f32.mrf.mxu1 }
 0x19c   :  { %v266_v43 = vmul.f32 0.2, %v262_v40  ;;  %v257_v44 = vadd.f32 %v256_v42, %v176_v41 }
 0x19e   :  { %v268_v45 = vmax.f32 %v262_v40, %v266_v43  ;;  %v265_v46 = vmul.f32 0.2, %v257_v44 }
 0x1a0   :  { %v267_v47 = vmax.f32 %v257_v44, %v265_v46  ;;  %494 = vmatpush3.msra.mxu0 %v268_v45 }
 0x1a1   :  { %495 = vmatprep.subr.mxu0 %v534_v37 }
 0x1a2   :  { %496 = vmatpush3.msra.mxu0 %v267_v47 }
 0x1a3   :  { %498 = vmatmul.mubr.msk.f32.vlgmr.msra.gmra.mxu0 %vm63_vm0, %v269_v48 }
 0x263   :  { %v345_v50 = vpop.f32.mrf.mxu0 }
 0x264   :  { %v346_v51 = vadd.f32 %v345_v50, %v274_v49 }
 0x265   :  { %v499_v52 = vpop.f32.mrf.mxu0 }
 0x266   :  { %v349_v53 = vmul.f32 0.2, %v346_v51 }
 0x268   :  { %v350_v54 = vmax.f32 %v346_v51, %v349_v53 }
 0x26a   :  { %501 = vmatpush3.msra.mxu1 %v350_v54 }
 0x26b   :  { %503 = vmatmul.mubr.msk.f32.vlgmr.msra.gmra.mxu1 %vm358_vm3, %v351_v55 }
 0x32b   :  { %v428_v57 = vpop.f32.mrf.mxu1 }
 0x32c   :  { %v429_v58 = vadd.f32 %v428_v57, %v356_v56 }
 0x32d   :  { %v504_v59 = vpop.f32.mrf.mxu1 }
 0x32e   :  { %432 = vst [vmem:[#allocation2] sm:$0xff] %v429_v58 }
 0x32f   :  { %522 = shalt.err (!%p519_p4)
}
 0x330   :  { %442 = dma.vmem_to_hbm [thread:$0]  %s440_s18, 128, %s660_s9, [#allocation3]  }
 0x331   :  { %531 = dma.done.wait [#allocation3], 128  }
 0x332   :  { %532 = vsyncadd [#allocation3], 4294967168 }
 0x333   :  { %446 = vsyncpa [#allocation3], 1 }

</bundles_post_ra>
